<compile_context>
chip_gen: v6e
topology: v6e:2x2x1
jax: 0.10.0
libtpu: 0.0.40
codegen_flags: <defaults>
</compile_context>

<pallas_src>
import jax
import jax.numpy as jnp
from jax.experimental import pallas as pl
from jax.experimental.pallas import tpu as pltpu

LANE = 128
SUBLANE_PACK = 16                        # bf16 packs 2 rows per sublane
_SIMPLE_PATH_MAX_BYTES = 16 * 1024 * 1024


def _round_up(x, m):
    return ((x + m - 1) // m) * m


def _vmem_capacity_bytes():
    try:
        cap = getattr(pltpu.get_tpu_info(), "vmem_capacity_bytes", None)
        if cap:
            return int(cap)
    except Exception:
        pass
    return 64 * 1024 * 1024              # conservative fallback (v7x physical)


def _pick_vmem_limit(footprint_bytes, cap):
    # Cover the kernel footprint plus Mosaic-internal scratch, never asking
    # for more than ~3/4 of physical VMEM.
    return int(min(cap * 3 // 4,
                   max(32 * 1024 * 1024, footprint_bytes + (8 << 20))))


def _largest_aligned_divisor(total, cap, quantum=LANE):
    """Largest multiple of `quantum` that divides `total` and is <= cap."""
    cap = max(quantum, min(cap, total))
    best = quantum
    t = quantum
    while t <= cap:
        if total % t == 0:
            best = t
        t += quantum
    return best


# ------------------------------- kernels -----------------------------------


def _linear_simple_kernel(x_ref, w_ref, b_ref, o_ref):
    # Whole problem resident in VMEM: single MXU matmul + bias.
    o_ref[...] = (
        jnp.dot(x_ref[...], w_ref[...], preferred_element_type=jnp.float32)
        + b_ref[...]
    )


def _linear_fgrid_kernel(x_ref, w_ref, b_ref, o_ref):
    # 1-D grid over the reduction (feature) axis: x and W are each read from
    # HBM exactly once.  The f32 output block has a constant block index, so
    # it stays VMEM-resident -> accumulate directly into it (no scratch, no
    # final copy); bias is folded into the k == 0 init.
    k = pl.program_id(0)

    @pl.when(k == 0)
    def _():
        o_ref[...] = jnp.broadcast_to(b_ref[...], o_ref.shape)

    o_ref[...] += jnp.dot(
        x_ref[...], w_ref[...], preferred_element_type=jnp.float32
    )


def _make_linear_2d_kernel(tk):
    # 2-D grid (batch tiles x k tiles).  If W fits in VMEM it arrives as one
    # full-extent block (fetched once, never re-streamed) and is sliced
    # in-kernel with pl.ds; otherwise w_ref is the streamed (tk, N) block.
    def kernel(x_ref, w_ref, b_ref, o_ref):
        k = pl.program_id(1)

        @pl.when(k == 0)
        def _():
            o_ref[...] = jnp.broadcast_to(b_ref[...], o_ref.shape)

        if w_ref.shape[0] == tk:                       # streaming layout
            w_blk = w_ref[...]
        else:                                          # VMEM-resident full W
            start = pl.multiple_of(k * tk, LANE)
            w_blk = w_ref[pl.ds(start, tk), :]

        o_ref[...] += jnp.dot(
            x_ref[...], w_blk, preferred_element_type=jnp.float32
        )

    return kernel


# ----------------------------- pallas_call wrappers -------------------------


def _simple_call(x_c, w_c, b_c, cap):
    Bx, F_pad = x_c.shape
    N_pad = w_c.shape[1]
    itemsize = x_c.dtype.itemsize
    footprint = (itemsize * (Bx * F_pad + F_pad * N_pad)
                 + 4 * (Bx * N_pad + N_pad))
    return pl.pallas_call(
        _linear_simple_kernel,
        out_shape=jax.ShapeDtypeStruct((Bx, N_pad), jnp.float32),
        in_specs=[
            pl.BlockSpec(memory_space=pltpu.MemorySpace.VMEM),
            pl.BlockSpec(memory_space=pltpu.MemorySpace.VMEM),
            pl.BlockSpec(memory_space=pltpu.MemorySpace.VMEM),
        ],
        out_specs=pl.BlockSpec(memory_space=pltpu.MemorySpace.VMEM),
        compiler_params=pltpu.CompilerParams(
            vmem_limit_bytes=_pick_vmem_limit(footprint, cap)),
        cost_estimate=pl.CostEstimate(
            flops=2 * Bx * F_pad * N_pad,
            transcendentals=0,
            bytes_accessed=footprint),
    )(x_c, w_c, b_c)


def _fgrid_call(x_c, w_c, b_c, tk, cap, budget):
    M_pad, F_pad = x_c.shape
    N_pad = w_c.shape[1]
    itemsize = x_c.dtype.itemsize

    if tk is None:
        fixed = 4 * M_pad * N_pad + 2 * 4 * N_pad        # resident out + bias
        per_tk = 2 * itemsize * (M_pad + N_pad)          # dbl-buffered x & W
        tk_cap = max(LANE, ((budget - fixed) // per_tk) // LANE * LANE)
        tk = _largest_aligned_divisor(F_pad, min(tk_cap, 8192))

    footprint = (2 * itemsize * tk * (M_pad + N_pad)
                 + 4 * M_pad * N_pad + 2 * 4 * N_pad)

    return pl.pallas_call(
        _linear_fgrid_kernel,
        out_shape=jax.ShapeDtypeStruct((M_pad, N_pad), jnp.float32),
        grid_spec=pltpu.PrefetchScalarGridSpec(
            num_scalar_prefetch=0,
            grid=(F_pad // tk,),
            in_specs=[
                pl.BlockSpec((M_pad, tk), lambda k: (0, k)),
                pl.BlockSpec((tk, N_pad), lambda k: (k, 0)),
                pl.BlockSpec((1, N_pad), lambda k: (0, 0)),
            ],
            out_specs=pl.BlockSpec((M_pad, N_pad), lambda k: (0, 0)),
        ),
        compiler_params=pltpu.CompilerParams(
            dimension_semantics=("arbitrary",),          # reduction axis
            vmem_limit_bytes=_pick_vmem_limit(footprint, cap),
        ),
        cost_estimate=pl.CostEstimate(
            flops=2 * M_pad * F_pad * N_pad,
            transcendentals=0,
            bytes_accessed=itemsize * (M_pad * F_pad + F_pad * N_pad)
                           + 4 * (M_pad * N_pad + N_pad),
        ),
    )(x_c, w_c, b_c)


def _2d_call(x_c, w_c, b_c, tk, tm, w_resident, cap, budget):
    M, F_pad = x_c.shape
    N_pad = w_c.shape[1]
    itemsize = x_c.dtype.itemsize

    if tm is None:
        tm = min(512, _round_up(M, SUBLANE_PACK))
    else:
        tm = max(SUBLANE_PACK, (int(tm) // SUBLANE_PACK) * SUBLANE_PACK)
        tm = min(tm, _round_up(M, SUBLANE_PACK))
    M_pad = _round_up(M, tm)

    # Hold all of W on-chip when it fits the generation's VMEM budget (charged
    # 2x to stay conservative about pipeline buffering); otherwise stream it.
    # TODO(synk): on v7x, fp8-quantized W would both fit 64 MiB VMEM for larger
    # F and halve weight HBM traffic when streaming is unavoidable.
    w_bytes = itemsize * F_pad * N_pad
    if w_resident is None:
        w_resident = (2 * w_bytes) <= budget // 2

    if tk is None:
        out_bytes = 2 * 4 * tm * N_pad + 2 * 4 * N_pad
        if w_resident:
            avail = budget - 2 * w_bytes - out_bytes
            tk_cap = max(LANE, (avail // (2 * itemsize * tm)) // LANE * LANE)
        else:
            avail = budget - out_bytes
            tk_cap = max(
                LANE, (avail // (2 * itemsize * (tm + N_pad))) // LANE * LANE)
        tk = _largest_aligned_divisor(F_pad, min(tk_cap, 4096))

    if M_pad != M:
        x_c = jnp.pad(x_c, ((0, M_pad - M), (0, 0)))

    if w_resident:
        # Full-extent block, constant block index -> DMA'd once, kept resident.
        w_spec = pl.BlockSpec((F_pad, N_pad), lambda i, k: (0, 0))
        w_footprint = 2 * w_bytes
        w_hbm_elems = F_pad * N_pad
    else:
        w_spec = pl.BlockSpec((tk, N_pad), lambda i, k: (k, 0))
        w_footprint = 2 * itemsize * tk * N_pad
        w_hbm_elems = F_pad * N_pad * (M_pad // tm)      # re-streamed per tile

    footprint = (2 * itemsize * tm * tk + w_footprint
                 + 2 * 4 * tm * N_pad + 2 * 4 * N_pad)

    return pl.pallas_call(
        _make_linear_2d_kernel(tk),
        out_shape=jax.ShapeDtypeStruct((M_pad, N_pad), jnp.float32),
        grid_spec=pltpu.PrefetchScalarGridSpec(
            num_scalar_prefetch=0,
            grid=(M_pad // tm, F_pad // tk),
            in_specs=[
                pl.BlockSpec((tm, tk), lambda i, k: (i, k)),
                w_spec,
                pl.BlockSpec((1, N_pad), lambda i, k: (0, 0)),
            ],
            out_specs=pl.BlockSpec((tm, N_pad), lambda i, k: (i, 0)),
        ),
        compiler_params=pltpu.CompilerParams(
            # TODO(synk): switch axis 0 to pltpu.CORE_PARALLEL once verified on
            # v7x megacore; "parallel" is safe (and a no-op on 1-TC v5e/v6e).
            dimension_semantics=("parallel", "arbitrary"),
            vmem_limit_bytes=_pick_vmem_limit(footprint, cap),
        ),
        cost_estimate=pl.CostEstimate(
            flops=2 * M_pad * F_pad * N_pad,
            transcendentals=0,
            bytes_accessed=itemsize * (M_pad * F_pad + w_hbm_elems)
                           + 4 * (M_pad * N_pad + N_pad),
        ),
    )(x_c, w_c, b_c)


# ------------------------------- public API ---------------------------------


def linear_classifier(x_flat, w, b, *, compute_dtype=jnp.bfloat16,
                      path=None, tk=None, tm=None, w_resident=None):
    """y = x_flat @ w + b on TPU via Pallas.  Returns (B, N) float32.

    compute_dtype: MXU input dtype (accumulation is always f32).  bf16 halves
        HBM traffic for this memory-bound kernel; pass jnp.float32 for
        bit-faithful f32 numerics.
    path: None (auto) | "simple" | "fgrid" | "2d".
    tk / tm / w_resident: optional tiling overrides (testing / tuning).
    """
    B, F = x_flat.shape
    N = w.shape[1]

    # Cast *before* padding so the wrapper-side pad/cast passes (un-hidden HBM
    # traffic) move the minimum number of bytes; no f32 round trip for W.
    x_c = x_flat.astype(compute_dtype)
    w_c = w.astype(compute_dtype)
    b_c = jnp.reshape(b, (1, N)).astype(jnp.float32)

    # Lane-pad the class dim so output stores are unmasked and MXU columns are
    # dense.  Deliberately NOT padded to 256 (kernel is HBM-bound; wider N
    # would only add W/output bytes).
    N_pad = _round_up(max(N, LANE), LANE)
    if N_pad != N:
        w_c = jnp.pad(w_c, ((0, 0), (0, N_pad - N)))
        b_c = jnp.pad(b_c, ((0, 0), (0, N_pad - N)))

    # Pad the feature axis only if it is not already lane aligned.
    F_pad = _round_up(F, LANE)
    if F_pad != F:
        x_c = jnp.pad(x_c, ((0, 0), (0, F_pad - F)))
        w_c = jnp.pad(w_c, ((0, F_pad - F), (0, 0)))

    itemsize = jnp.dtype(compute_dtype).itemsize
    cap = _vmem_capacity_bytes()
    budget = int(cap * 0.45)             # working-set cap for tile selection

    if tk is not None:
        tk = max(LANE, (int(tk) // LANE) * LANE)
        if F_pad % tk != 0:
            tk = _largest_aligned_divisor(F_pad, tk)

    if path is None:
        in_bytes = itemsize * (B * F_pad + F_pad * N_pad)
        m_cand = _round_up(B, SUBLANE_PACK)
        if in_bytes + 4 * B * N_pad <= _SIMPLE_PATH_MAX_BYTES:
            path = "simple"
        elif 4 * m_cand * N_pad + 2 * itemsize * (m_cand + N_pad) * LANE <= budget:
            path = "fgrid"               # x and W each read from HBM once
        else:
            path = "2d"                  # large batch: tile M, keep W resident

    if path == "simple":
        out = _simple_call(x_c, w_c, b_c, cap)
        return out[:, :N]

    # Row-pad the batch only to the 16-row bf16 sublane pack — never to the
    # batch-tile size (avoids materializing big garbage-row copies of x).
    M_pad = _round_up(B, SUBLANE_PACK)
    if M_pad != B:
        x_c = jnp.pad(x_c, ((0, M_pad - B), (0, 0)))

    if path == "fgrid":
        out = _fgrid_call(x_c, w_c, b_c, tk, cap, budget)
    elif path == "2d":
        out = _2d_call(x_c, w_c, b_c, tk, tm, w_resident, cap, budget)
    else:
        raise ValueError(f"unknown path: {path!r}")
    return out[:B, :N]


def word_bag_forward(x, w, b, **opts):
    """
    WordBag.forward with a linear frame classifier.
      x: (B, C, D, H, W) with D == 1
    """
    assert x.shape[2] == 1, "WordBag requires depth dimension == 1"
    x = jnp.squeeze(x, axis=2)                 # (B, C, H, W)
    x_flat = x.reshape(x.shape[0], -1)         # (B, C*H*W) -- classifier glue
    return linear_classifier(x_flat, w, b, **opts)


if __name__ == "__main__":
    key = jax.random.PRNGKey(0)
    kx, kw, kb, kx2, kw2, kb2, kx3 = jax.random.split(key, 7)

    # --- 1) Tiny shapes, f32 numerics: simple (no-grid) single-shot path. ---
    B, C, D, H, W = 2, 4, 1, 16, 16
    NUM_CLASSES = 16
    F = C * H * W

    x = jax.random.normal(kx, (B, C, D, H, W), dtype=jnp.float32)
    w = jax.random.normal(kw, (F, NUM_CLASSES), dtype=jnp.float32) * 0.02
    b = jax.random.normal(kb, (1, NUM_CLASSES), dtype=jnp.float32) * 0.01

    out = word_bag_forward(x, w, b, compute_dtype=jnp.float32)
    jax.block_until_ready(out)
    ref = jnp.squeeze(x, axis=2).reshape(B, -1) @ w + b
    assert out.shape == (B, NUM_CLASSES)
    assert jnp.allclose(out, ref, atol=1e-4, rtol=1e-4)

    # --- 2) fgrid path: 1-D grid over F (x & W read once), bf16 in / f32 acc. ---
    B2, C2, H2, W2 = 16, 4, 32, 32
    F2 = C2 * H2 * W2
    x2 = jax.random.normal(kx2, (B2, C2, 1, H2, W2), dtype=jnp.float32)
    w2 = jax.random.normal(kw2, (F2, NUM_CLASSES), dtype=jnp.float32) * 0.02
    b2 = jax.random.normal(kb2, (1, NUM_CLASSES), dtype=jnp.float32) * 0.01

    ref2 = jnp.squeeze(x2, axis=2).reshape(B2, -1) @ w2 + b2
    out2 = word_bag_forward(x2, w2, b2, path="fgrid", tk=1024)
    jax.block_until_ready(out2)
    assert out2.shape == (B2, NUM_CLASSES)
    assert jnp.allclose(out2, ref2, atol=1e-1, rtol=5e-2)   # bf16 inputs

    # --- 3) 2-D path, W VMEM-resident (full-extent BlockSpec + in-kernel pl.ds). ---
    B3 = 48
    x3 = jax.random.normal(kx3, (B3, C2, 1, H2, W2), dtype=jnp.float32)
    ref3 = jnp.squeeze(x3, axis=2).reshape(B3, -1) @ w2 + b2

    out3 = word_bag_forward(x3, w2, b2, path="2d", tk=1024, tm=16)
    jax.block_until_ready(out3)
    assert out3.shape == (B3, NUM_CLASSES)
    assert jnp.allclose(out3, ref3, atol=1e-1, rtol=5e-2)

    # --- 4) 2-D path, streaming-W fallback layout. ---
    out4 = word_bag_forward(x3, w2, b2, path="2d", tk=1024, tm=16,
                            w_resident=False)
    jax.block_until_ready(out4)
    assert jnp.allclose(out4, ref3, atol=1e-1, rtol=5e-2)

    print("KERNEL_OK")
</pallas_src>

<mosaic_0001>
module attributes {stable_mosaic.version = 11 : i64} {
  func.func @_linear_simple_kernel(%arg0: memref<2x1024xf32, #tpu.memory_space<vmem>>, %arg1: memref<1024x128xf32, #tpu.memory_space<vmem>>, %arg2: memref<1x128xf32, #tpu.memory_space<vmem>>, %arg3: memref<2x128xf32, #tpu.memory_space<vmem>>) attributes {dimension_semantics = [], scalar_prefetch = 0 : i64, scratch_operands = 0 : i64, tpu.core_type = #tpu.core_type<tc>} {
    %c0 = arith.constant 0 : index
    %c0_0 = arith.constant 0 : index
    %0 = vector.load %arg0[%c0, %c0_0] : memref<2x1024xf32, #tpu.memory_space<vmem>>, vector<2x1024xf32>
    %c0_1 = arith.constant 0 : index
    %c0_2 = arith.constant 0 : index
    %1 = vector.load %arg1[%c0_1, %c0_2] : memref<1024x128xf32, #tpu.memory_space<vmem>>, vector<1024x128xf32>
    %cst = arith.constant dense<0.000000e+00> : vector<2x128xf32>
    %2 = tpu.matmul %0, %1, %cst {dimension_numbers = #tpu.dot_dimension_numbers<[1], [0], [0], [1], [0, 0, 1, 1], [], []>} : vector<2x1024xf32>, vector<1024x128xf32>, vector<2x128xf32> -> vector<2x128xf32>
    %c0_3 = arith.constant 0 : index
    %c0_4 = arith.constant 0 : index
    %3 = vector.load %arg2[%c0_3, %c0_4] : memref<1x128xf32, #tpu.memory_space<vmem>>, vector<1x128xf32>
    %4 = vector.broadcast %3 : vector<1x128xf32> to vector<2x128xf32>
    %5 = arith.addf %2, %4 : vector<2x128xf32>
    %c0_5 = arith.constant 0 : index
    %c0_6 = arith.constant 0 : index
    %6 = vector.load %arg3[%c0_5, %c0_6] : memref<2x128xf32, #tpu.memory_space<vmem>>, vector<2x128xf32>
    tpu.vector_store %arg3[%c0_5, %c0_6], %5 {strides = array<i32>} : memref<2x128xf32, #tpu.memory_space<vmem>>, vector<2x128xf32>,
    return
  }
}

</mosaic_0001>

<bundles_post_ra>
// kernel: tpu_custom_call.1
= control target key start
LH: loop header
LB: loop body
LE: loop exit
PB: predicated region body
PF: predicated region fallthrough
CT: control target
= control target key end

     0   :  { %8 = vsyncpa [#allocation3], 0  ;;  %s778_s0 = inlined_call_operand.hbm [shape: f32[2,1024], index: 0, kind: input, shape index: {}]   ;;  %s779_s1 = inlined_call_operand.hbm [shape: f32[1024,128], index: 1, kind: input, shape index: {}]   ;;  %s780_s2 = inlined_call_operand.vmem [shape: f32[1,128], index: 2, kind: input, shape index: {}]   ;;  %s781_s3 = inlined_call_operand.hbm [shape: f32[2,128], index: 3, kind: output, shape index: {}]  }
   0x1   :  { %9 = vsyncpa [#allocation6], 0 }
   0x2   :  { %10 = vsyncpa [#allocation4], 0  ;;  %s734_s12 = smov [#allocation2]   ;;  %s735_s14 = smov [#allocation5]  }
   0x3   :  { %s17_s13 = sshll.u32 %s734_s12, 4  ;;  %s26_s15 = sshll.u32 %s735_s14, 4  ;;  %s18_s13 = int_to_ptr.vmem [resolvable:$true] %s17_s13  ;;  %s27_s15 = int_to_ptr.vmem [resolvable:$true] %s26_s15 }
   0x4   :  { %s676_s16 = scalar_lea.vmem %s18_s13, 256  ;;  %p681_p1 = scmp.lt.s32.totalorder %s18_s13, %s18_s13 }
   0x5   :  { %p677_p0 = scmp.ne.s32.totalorder %s18_s13, %s676_s16  ;;  %p682_p2 = scmp.lt.s32.totalorder %s676_s16, %s676_s16 }
   0x7   :  { %p683_p3 = por %p682_p2, %p681_p1 }
   0x9   :  { %p684_p4 = pnand %p683_p3, %p677_p0 }
   0xb   :  { %687 = shalt.err (!%p684_p4)
}
   0xc   :  { %20 = dma.hbm_to_vmem [thread:$0]  %s778_s0, 256, %s18_s13, [#allocation3]  }
   0xd   :  { %s696_s19 = scalar_lea.vmem %s27_s15, 16384  ;;  %p701_p6 = scmp.lt.s32.totalorder %s27_s15, %s27_s15 }
   0xe   :  { %p697_p5 = scmp.ne.s32.totalorder %s27_s15, %s696_s19  ;;  %p702_p7 = scmp.lt.s32.totalorder %s696_s19, %s696_s19 }
  0x10   :  { %p703_p8 = por %p702_p7, %p701_p6 }
  0x12   :  { %p704_p9 = pnand %p703_p8, %p697_p5 }
  0x14   :  { %707 = shalt.err (!%p704_p9)
}
  0x15   :  { %s736_s20 = smov 128   ;;  %s737_s21 = smov 8  }
  0x16   :  { %32 = dma.hbm_to_vmem [thread:$0]  %s779_s1, 16384, %s27_s15, [#allocation6], %s736_s20, %s736_s20, %s737_s21  }
  0x17   :  { %728 = dma.done.wait [#allocation3], 256  }
  0x18   :  { %729 = vsyncadd [#allocation3], 4294967040 }
  0x19   :  { %730 = dma.done.wait [#allocation6], 16384  }
  0x1a   :  { %731 = vsyncadd [#allocation6], 4294950912  ;;  %v74_v0 = vld [vmem:[#allocation5 + $0xf8] sm:$0xff]  ;;  %v73_v4 = vld [vmem:[#allocation5 + $0xf0] sm:$0xff]  ;;  %v738_v30 = vmov 1983009808   ;;  %v184_v32 = vlaneseq }
  0x1b   :  { %v106_v1 = vld [vmem:[#allocation5 + $0x1f8] sm:$0xff]  ;;  %520 = vmatprep.subr.mxu0 %v74_v0  ;;  %v105_v5 = vld [vmem:[#allocation5 + $0x1f0] sm:$0xff]  ;;  %v72_v8 = vld [vmem:[#allocation5 + $0xe8] sm:$0xff]  ;;  %v182_v31 = vunpack.c.l.s4 %v738_v30  ;;  %s739_s24 = smov [#allocation7]  }
  0x1c   :  { %v58_v2 = vld [vmem:[#allocation5 + $0x78] sm:$0xff]  ;;  %555 = vmatprep.subr.mxu1 %v106_v1  ;;  %v57_v6 = vld [vmem:[#allocation5 + $0x70] sm:$0xff]  ;;  %v104_v9 = vld [vmem:[#allocation5 + $0x1e8] sm:$0xff]  ;;  %v185_v42 = vshrl.u32 %v184_v32, 7  ;;  %s509_s25 = sshll.u32 %s739_s24, 4  ;;  %s510_s25 = int_to_ptr.vmem [resolvable:$true] %s509_s25 }
  0x1d   :  { %v90_v3 = vld [vmem:[#allocation5 + $0x178] sm:$0xff]  ;;  %521 = vmatpush3.msra.mxu0 %v58_v2  ;;  %v89_v7 = vld [vmem:[#allocation5 + $0x170] sm:$0xff]  ;;  %v56_v10 = vld [vmem:[#allocation5 + $0x68] sm:$0xff]  ;;  %v183_v41 = vunpack.c.0.s8 %v182_v31  ;;  %s708_s26 = scalar_lea.vmem %s510_s25, 32  ;;  %p713_p11 = scmp.lt.s32.totalorder %s510_s25, %s510_s25 }
  0x1e   :  { %556 = vmatpush3.msra.mxu1 %v90_v3  ;;  %522 = vmatprep.subr.mxu0 %v73_v4  ;;  %v88_v11 = vld [vmem:[#allocation5 + $0x168] sm:$0xff]  ;;  %v71_v12 = vld [vmem:[#allocation5 + $0xe0] sm:$0xff]  ;;  %v70_v16 = vld [vmem:[#allocation5 + $0xd8] sm:$0xff]  ;;  %p709_p10 = scmp.ne.s32.totalorder %s510_s25, %s708_s26  ;;  %p714_p12 = scmp.lt.s32.totalorder %s708_s26, %s708_s26 }
  0x1f   :  { %557 = vmatprep.subr.mxu1 %v105_v5  ;;  %523 = vmatpush3.msra.mxu0 %v57_v6  ;;  %v103_v13 = vld [vmem:[#allocation5 + $0x1e0] sm:$0xff]  ;;  %v102_v17 = vld [vmem:[#allocation5 + $0x1d8] sm:$0xff]  ;;  %v69_v20 = vld [vmem:[#allocation5 + $0xd0] sm:$0xff]  ;;  %v766_v51 = vsub.s32 %v183_v41, %v185_v42 }
  0x20   :  { %558 = vmatpush3.msra.mxu1 %v89_v7  ;;  %524 = vmatprep.subr.mxu0 %v72_v8  ;;  %v55_v14 = vld [vmem:[#allocation5 + $0x60] sm:$0xff]  ;;  %v54_v18 = vld [vmem:[#allocation5 + $0x58] sm:$0xff]  ;;  %v101_v21 = vld [vmem:[#allocation5 + $0x1d0] sm:$0xff]  ;;  %p715_p13 = por %p714_p12, %p713_p11 }
  0x21   :  { %559 = vmatprep.subr.mxu1 %v104_v9  ;;  %v87_v15 = vld [vmem:[#allocation5 + $0x160] sm:$0xff]  ;;  %525 = vmatpush3.msra.mxu0 %v56_v10  ;;  %v86_v19 = vld [vmem:[#allocation5 + $0x158] sm:$0xff]  ;;  %v53_v22 = vld [vmem:[#allocation5 + $0x50] sm:$0xff] }
  0x22   :  { %560 = vmatpush3.msra.mxu1 %v88_v11  ;;  %526 = vmatprep.subr.mxu0 %v71_v12  ;;  %v85_v23 = vld [vmem:[#allocation5 + $0x150] sm:$0xff]  ;;  %v68_v24 = vld [vmem:[#allocation5 + $0xc8] sm:$0xff]  ;;  %v67_v28 = vld [vmem:[#allocation5 + $0xc0] sm:$0xff]  ;;  %p716_p0 = pnand %p715_p13, %p709_p10 }
  0x23   :  { %561 = vmatprep.subr.mxu1 %v103_v13  ;;  %527 = vmatpush3.msra.mxu0 %v55_v14  ;;  %v100_v25 = vld [vmem:[#allocation5 + $0x1c8] sm:$0xff]  ;;  %v99_v29 = vld [vmem:[#allocation5 + $0x1c0] sm:$0xff]  ;;  %v66_v35 = vld [vmem:[#allocation5 + $0xb8] sm:$0xff] }
  0x24   :  { %562 = vmatpush3.msra.mxu1 %v87_v15  ;;  %528 = vmatprep.subr.mxu0 %v70_v16  ;;  %v52_v26 = vld [vmem:[#allocation5 + $0x48] sm:$0xff]  ;;  %v51_v33 = vld [vmem:[#allocation5 + $0x40] sm:$0xff]  ;;  %v98_v36 = vld [vmem:[#allocation5 + $0x1b8] sm:$0xff] }
  0x25   :  { %563 = vmatprep.subr.mxu1 %v102_v17  ;;  %529 = vmatpush3.msra.mxu0 %v54_v18  ;;  %v84_v27 = vld [vmem:[#allocation5 + $0x148] sm:$0xff]  ;;  %v83_v34 = vld [vmem:[#allocation5 + $0x140] sm:$0xff]  ;;  %v50_v37 = vld [vmem:[#allocation5 + $0x38] sm:$0xff] }
  0x26   :  { %564 = vmatpush3.msra.mxu1 %v86_v19  ;;  %530 = vmatprep.subr.mxu0 %v69_v20  ;;  %v82_v38 = vld [vmem:[#allocation5 + $0x138] sm:$0xff]  ;;  %v65_v39 = vld [vmem:[#allocation5 + $0xb0] sm:$0xff]  ;;  %v64_v45 = vld [vmem:[#allocation5 + $0xa8] sm:$0xff] }
  0x27   :  { %565 = vmatprep.subr.mxu1 %v101_v21  ;;  %531 = vmatpush3.msra.mxu0 %v53_v22  ;;  %v97_v40 = vld [vmem:[#allocation5 + $0x1b0] sm:$0xff]  ;;  %v96_v46 = vld [vmem:[#allocation5 + $0x1a8] sm:$0xff]  ;;  %v63_v49 = vld [vmem:[#allocation5 + $0xa0] sm:$0xff] }
  0x28   :  { %566 = vmatpush3.msra.mxu1 %v85_v23  ;;  %532 = vmatprep.subr.mxu0 %v68_v24  ;;  %v49_v43 = vld [vmem:[#allocation5 + $0x30] sm:$0xff]  ;;  %v48_v47 = vld [vmem:[#allocation5 + $0x28] sm:$0xff]  ;;  %v95_v50 = vld [vmem:[#allocation5 + $0x1a0] sm:$0xff] }
  0x29   :  { %567 = vmatprep.subr.mxu1 %v100_v25  ;;  %533 = vmatpush3.msra.mxu0 %v52_v26  ;;  %v81_v44 = vld [vmem:[#allocation5 + $0x130] sm:$0xff]  ;;  %v80_v48 = vld [vmem:[#allocation5 + $0x128] sm:$0xff]  ;;  %v47_v52 = vld [vmem:[#allocation5 + $0x20] sm:$0xff] }
  0x2a   :  { %568 = vmatpush3.msra.mxu1 %v84_v27  ;;  %534 = vmatprep.subr.mxu0 %v67_v28  ;;  %v79_v53 = vld [vmem:[#allocation5 + $0x120] sm:$0xff]  ;;  %v41_v54 = vld [vmem:[#allocation2] sm:$0xff]  ;;  %v62_v55 = vld [vmem:[#allocation5 + $0x98] sm:$0xff] }
  0x2b   :  { %569 = vmatprep.subr.mxu1 %v99_v29  ;;  %535 = vmatpush3.msra.mxu0 %v51_v33  ;;  %v94_v56 = vld [vmem:[#allocation5 + $0x198] sm:$0xff]  ;;  %v180_v57 = vcombine.high %v41_v54, %v41_v54  ;;  %v61_v60 = vld [vmem:[#allocation5 + $0x90] sm:$0xff]  ;;  %v187_v62 = vrot.slane %v41_v54, %v766_v51  ;;  %v60_v1 = vld [vmem:[#allocation5 + $0x88] sm:$0xff] }
  0x2c   :  { %570 = vmatpush3.msra.mxu1 %v83_v34  ;;  %536 = vmatprep.subr.mxu0 %v66_v35  ;;  %v46_v58 = vld [vmem:[#allocation5 + $0x18] sm:$0xff]  ;;  %v93_v61 = vld [vmem:[#allocation5 + $0x190] sm:$0xff]  ;;  %v92_v2 = vld [vmem:[#allocation5 + $0x188] sm:$0xff] }
  0x2d   :  { %571 = vmatprep.subr.mxu1 %v98_v36  ;;  %537 = vmatpush3.msra.mxu0 %v50_v37  ;;  %v78_v59 = vld [vmem:[#allocation5 + $0x118] sm:$0xff]  ;;  %v45_v63 = vld [vmem:[#allocation5 + $0x10] sm:$0xff]  ;;  %v194_v3 = vrot.slane %v180_v57, %v766_v51  ;;  %v44_v4 = vld [vmem:[#allocation5 + $0x8] sm:$0xff]  ;;  %v195_v8 = vcombine.high %v187_v62, %v187_v62 }
  0x2e   :  { %572 = vmatpush3.msra.mxu1 %v82_v38  ;;  %538 = vmatprep.subr.mxu0 %v65_v39  ;;  %v77_v0 = vld [vmem:[#allocation5 + $0x110] sm:$0xff]  ;;  %v76_v5 = vld [vmem:[#allocation5 + $0x108] sm:$0xff]  ;;  %v59_v6 = vld [vmem:[#allocation5 + $0x80] sm:$0xff] }
  0x2f   :  { %573 = vmatprep.subr.mxu1 %v97_v40  ;;  %539 = vmatpush3.msra.mxu0 %v49_v43  ;;  %v91_v7 = vld [vmem:[#allocation5 + $0x180] sm:$0xff]  ;;  %v196_v11 = vcombine.high %v194_v3, %v194_v3  ;;  %v138_v12 = vld [vmem:[#allocation5 + $0x2f8] sm:$0xff]  ;;  %v137_v16 = vld [vmem:[#allocation5 + $0x2f0] sm:$0xff] }
  0x30   :  { %574 = vmatpush3.msra.mxu1 %v81_v44  ;;  %540 = vmatprep.subr.mxu0 %v64_v45  ;;  %v43_v9 = vld [vmem:[#allocation5] sm:$0xff]  ;;  %v170_v13 = vld [vmem:[#allocation5 + $0x3f8] sm:$0xff]  ;;  %v169_v17 = vld [vmem:[#allocation5 + $0x3f0] sm:$0xff] }
  0x31   :  { %575 = vmatprep.subr.mxu1 %v96_v46  ;;  %541 = vmatpush3.msra.mxu0 %v48_v47  ;;  %v75_v10 = vld [vmem:[#allocation5 + $0x100] sm:$0xff]  ;;  %v122_v14 = vld [vmem:[#allocation5 + $0x278] sm:$0xff]  ;;  %v121_v18 = vld [vmem:[#allocation5 + $0x270] sm:$0xff] }
  0x32   :  { %576 = vmatpush3.msra.mxu1 %v80_v48  ;;  %542 = vmatprep.subr.mxu0 %v63_v49  ;;  %v154_v15 = vld [vmem:[#allocation5 + $0x378] sm:$0xff]  ;;  %v153_v19 = vld [vmem:[#allocation5 + $0x370] sm:$0xff]  ;;  %v136_v20 = vld [vmem:[#allocation5 + $0x2e8] sm:$0xff] }
  0x33   :  { %577 = vmatprep.subr.mxu1 %v95_v50  ;;  %543 = vmatpush3.msra.mxu0 %v47_v52  ;;  %v168_v21 = vld [vmem:[#allocation5 + $0x3e8] sm:$0xff]  ;;  %v135_v24 = vld [vmem:[#allocation5 + $0x2e0] sm:$0xff]  ;;  %v134_v28 = vld [vmem:[#allocation5 + $0x2d8] sm:$0xff] }
  0x34   :  { %578 = vmatpush3.msra.mxu1 %v79_v53  ;;  %544 = vmatprep.subr.mxu0 %v62_v55  ;;  %v120_v22 = vld [vmem:[#allocation5 + $0x268] sm:$0xff]  ;;  %v167_v25 = vld [vmem:[#allocation5 + $0x3e0] sm:$0xff]  ;;  %v166_v29 = vld [vmem:[#allocation5 + $0x3d8] sm:$0xff] }
  0x35   :  { %579 = vmatprep.subr.mxu1 %v94_v56  ;;  %545 = vmatpush3.msra.mxu0 %v46_v58  ;;  %v152_v23 = vld [vmem:[#allocation5 + $0x368] sm:$0xff]  ;;  %v119_v26 = vld [vmem:[#allocation5 + $0x260] sm:$0xff]  ;;  %v118_v30 = vld [vmem:[#allocation5 + $0x258] sm:$0xff] }
  0x36   :  { %580 = vmatpush3.msra.mxu1 %v78_v59  ;;  %546 = vmatprep.subr.mxu0 %v61_v60  ;;  %v151_v27 = vld [vmem:[#allocation5 + $0x360] sm:$0xff]  ;;  %v150_v31 = vld [vmem:[#allocation5 + $0x358] sm:$0xff]  ;;  %v133_v32 = vld [vmem:[#allocation5 + $0x2d0] sm:$0xff] }
  0x37   :  { %581 = vmatprep.subr.mxu1 %v93_v61  ;;  %547 = vmatpush3.msra.mxu0 %v45_v63  ;;  %v165_v33 = vld [vmem:[#allocation5 + $0x3d0] sm:$0xff]  ;;  %v132_v36 = vld [vmem:[#allocation5 + $0x2c8] sm:$0xff]  ;;  %v131_v40 = vld [vmem:[#allocation5 + $0x2c0] sm:$0xff] }
  0x38   :  { %582 = vmatpush3.msra.mxu1 %v77_v0  ;;  %548 = vmatprep.subr.mxu0 %v60_v1  ;;  %v117_v34 = vld [vmem:[#allocation5 + $0x250] sm:$0xff]  ;;  %v164_v37 = vld [vmem:[#allocation5 + $0x3c8] sm:$0xff]  ;;  %v163_v41 = vld [vmem:[#allocation5 + $0x3c0] sm:$0xff] }
  0x39   :  { %583 = vmatprep.subr.mxu1 %v92_v2  ;;  %549 = vmatpush3.msra.mxu0 %v44_v4  ;;  %v149_v35 = vld [vmem:[#allocation5 + $0x350] sm:$0xff]  ;;  %v116_v38 = vld [vmem:[#allocation5 + $0x248] sm:$0xff]  ;;  %v115_v42 = vld [vmem:[#allocation5 + $0x240] sm:$0xff] }
  0x3a   :  { %584 = vmatpush3.msra.mxu1 %v76_v5  ;;  %550 = vmatprep.subr.mxu0 %v59_v6  ;;  %v148_v39 = vld [vmem:[#allocation5 + $0x348] sm:$0xff]  ;;  %v147_v43 = vld [vmem:[#allocation5 + $0x340] sm:$0xff]  ;;  %v130_v44 = vld [vmem:[#allocation5 + $0x2b8] sm:$0xff] }
  0x3b   :  { %585 = vmatprep.subr.mxu1 %v91_v7  ;;  %551 = vmatpush3.msra.mxu0 %v43_v9  ;;  %v162_v45 = vld [vmem:[#allocation5 + $0x3b8] sm:$0xff]  ;;  %v129_v48 = vld [vmem:[#allocation5 + $0x2b0] sm:$0xff]  ;;  %v128_v53 = vld [vmem:[#allocation5 + $0x2a8] sm:$0xff] }
  0x3c   :  { %286 = vmatprep.mubr.f32.mxu0 %v195_v8  ;;  %586 = vmatpush3.msra.mxu1 %v75_v10  ;;  %v114_v46 = vld [vmem:[#allocation5 + $0x238] sm:$0xff]  ;;  %v161_v49 = vld [vmem:[#allocation5 + $0x3b0] sm:$0xff]  ;;  %v160_v54 = vld [vmem:[#allocation5 + $0x3a8] sm:$0xff] }
  0x3d   :  { %287 = vmatmul.mubr.f32.vlgmr.msra.gmra.mxu0 %v187_v62  ;;  %356 = vmatprep.mubr.f32.mxu1 %v196_v11  ;;  %v146_v47 = vld [vmem:[#allocation5 + $0x338] sm:$0xff]  ;;  %v113_v50 = vld [vmem:[#allocation5 + $0x230] sm:$0xff]  ;;  %v112_v56 = vld [vmem:[#allocation5 + $0x228] sm:$0xff] }
  0x3e   :  { %590 = vmatprep.subr.mxu0 %v138_v12  ;;  %625 = vmatprep.subr.mxu1 %v170_v13  ;;  %v145_v52 = vld [vmem:[#allocation5 + $0x330] sm:$0xff]  ;;  %v42_v55 = vld [vmem:[#allocation2 + $0x8] sm:$0xff]  ;;  %v144_v57 = vld [vmem:[#allocation5 + $0x328] sm:$0xff] }
  0x3f   :  { %357 = vmatmul.mubr.f32.vlgmr.msra.gmra.mxu1 %v194_v3  ;;  %591 = vmatpush3.msra.mxu0 %v122_v14  ;;  %v127_v58 = vld [vmem:[#allocation5 + $0x2a0] sm:$0xff]  ;;  %v197_v62 = vcombine.high %v42_v55, %v42_v55  ;;  %v126_v63 = vld [vmem:[#allocation5 + $0x298] sm:$0xff]  ;;  %v125_v3 = vld [vmem:[#allocation5 + $0x290] sm:$0xff]  ;;  %v204_v5 = vrot.slane %v42_v55, %v766_v51 }
  0x40   :  { %626 = vmatpush3.msra.mxu1 %v154_v15  ;;  %592 = vmatprep.subr.mxu0 %v137_v16  ;;  %v159_v59 = vld [vmem:[#allocation5 + $0x3a0] sm:$0xff]  ;;  %v158_v0 = vld [vmem:[#allocation5 + $0x398] sm:$0xff]  ;;  %v157_v4 = vld [vmem:[#allocation5 + $0x390] sm:$0xff] }
  0x41   :  { %627 = vmatprep.subr.mxu1 %v169_v17  ;;  %593 = vmatpush3.msra.mxu0 %v121_v18  ;;  %v111_v60 = vld [vmem:[#allocation5 + $0x220] sm:$0xff]  ;;  %v110_v1 = vld [vmem:[#allocation5 + $0x218] sm:$0xff]  ;;  %v109_v6 = vld [vmem:[#allocation5 + $0x210] sm:$0xff]  ;;  %v211_v8 = vrot.slane %v197_v62, %v766_v51  ;;  %v212_v15 = vcombine.high %v204_v5, %v204_v5 }
  0x42   :  { %628 = vmatpush3.msra.mxu1 %v153_v19  ;;  %594 = vmatprep.subr.mxu0 %v136_v20  ;;  %v143_v61 = vld [vmem:[#allocation5 + $0x320] sm:$0xff]  ;;  %v142_v2 = vld [vmem:[#allocation5 + $0x318] sm:$0xff]  ;;  %v141_v7 = vld [vmem:[#allocation5 + $0x310] sm:$0xff] }
  0x43   :  { %629 = vmatprep.subr.mxu1 %v168_v21  ;;  %595 = vmatpush3.msra.mxu0 %v120_v22  ;;  %v124_v9 = vld [vmem:[#allocation5 + $0x288] sm:$0xff]  ;;  %v123_v13 = vld [vmem:[#allocation5 + $0x280] sm:$0xff]  ;;  %v213_v17 = vcombine.high %v211_v8, %v211_v8  ;;  %v519_v22 = vld [vmem:[%s780_s2] ss:$0 sm:$0xff] }
  0x44   :  { %630 = vmatpush3.msra.mxu1 %v152_v23  ;;  %596 = vmatprep.subr.mxu0 %v135_v24  ;;  %v156_v10 = vld [vmem:[#allocation5 + $0x388] sm:$0xff]  ;;  %v155_v14 = vld [vmem:[#allocation5 + $0x380] sm:$0xff] }
  0x45   :  { %631 = vmatprep.subr.mxu1 %v167_v25  ;;  %597 = vmatpush3.msra.mxu0 %v119_v26  ;;  %v108_v11 = vld [vmem:[#allocation5 + $0x208] sm:$0xff]  ;;  %v107_v16 = vld [vmem:[#allocation5 + $0x200] sm:$0xff] }
  0x46   :  { %632 = vmatpush3.msra.mxu1 %v151_v27  ;;  %598 = vmatprep.subr.mxu0 %v134_v28  ;;  %v140_v12 = vld [vmem:[#allocation5 + $0x308] sm:$0xff]  ;;  %v139_v51 = vld [vmem:[#allocation5 + $0x300] sm:$0xff] }
  0x47   :  { %633 = vmatprep.subr.mxu1 %v166_v29  ;;  %599 = vmatpush3.msra.mxu0 %v118_v30 }
  0x48   :  { %634 = vmatpush3.msra.mxu1 %v150_v31  ;;  %600 = vmatprep.subr.mxu0 %v133_v32 }
  0x49   :  { %635 = vmatprep.subr.mxu1 %v165_v33  ;;  %601 = vmatpush3.msra.mxu0 %v117_v34 }
  0x4a   :  { %636 = vmatpush3.msra.mxu1 %v149_v35  ;;  %602 = vmatprep.subr.mxu0 %v132_v36 }
  0x4b   :  { %637 = vmatprep.subr.mxu1 %v164_v37  ;;  %603 = vmatpush3.msra.mxu0 %v116_v38 }
  0x4c   :  { %638 = vmatpush3.msra.mxu1 %v148_v39  ;;  %604 = vmatprep.subr.mxu0 %v131_v40 }
  0x4d   :  { %639 = vmatprep.subr.mxu1 %v163_v41  ;;  %605 = vmatpush3.msra.mxu0 %v115_v42 }
  0x4e   :  { %640 = vmatpush3.msra.mxu1 %v147_v43  ;;  %606 = vmatprep.subr.mxu0 %v130_v44 }
  0x4f   :  { %641 = vmatprep.subr.mxu1 %v162_v45  ;;  %607 = vmatpush3.msra.mxu0 %v114_v46 }
  0x50   :  { %642 = vmatpush3.msra.mxu1 %v146_v47  ;;  %608 = vmatprep.subr.mxu0 %v129_v48 }
  0x51   :  { %643 = vmatprep.subr.mxu1 %v161_v49  ;;  %609 = vmatpush3.msra.mxu0 %v113_v50 }
  0x52   :  { %644 = vmatpush3.msra.mxu1 %v145_v52  ;;  %610 = vmatprep.subr.mxu0 %v128_v53 }
  0x53   :  { %645 = vmatprep.subr.mxu1 %v160_v54  ;;  %611 = vmatpush3.msra.mxu0 %v112_v56 }
  0x54   :  { %646 = vmatpush3.msra.mxu1 %v144_v57  ;;  %612 = vmatprep.subr.mxu0 %v127_v58 }
  0x55   :  { %647 = vmatprep.subr.mxu1 %v159_v59  ;;  %613 = vmatpush3.msra.mxu0 %v111_v60 }
  0x56   :  { %648 = vmatpush3.msra.mxu1 %v143_v61  ;;  %614 = vmatprep.subr.mxu0 %v126_v63 }
  0x57   :  { %649 = vmatprep.subr.mxu1 %v158_v0  ;;  %615 = vmatpush3.msra.mxu0 %v110_v1 }
  0x58   :  { %650 = vmatpush3.msra.mxu1 %v142_v2  ;;  %616 = vmatprep.subr.mxu0 %v125_v3 }
  0x59   :  { %651 = vmatprep.subr.mxu1 %v157_v4  ;;  %617 = vmatpush3.msra.mxu0 %v109_v6 }
  0x5a   :  { %652 = vmatpush3.msra.mxu1 %v141_v7  ;;  %618 = vmatprep.subr.mxu0 %v124_v9 }
  0x5b   :  { %653 = vmatprep.subr.mxu1 %v156_v10  ;;  %619 = vmatpush3.msra.mxu0 %v108_v11 }
  0x5c   :  { %654 = vmatpush3.msra.mxu1 %v140_v12  ;;  %620 = vmatprep.subr.mxu0 %v123_v13 }
  0x5d   :  { %655 = vmatprep.subr.mxu1 %v155_v14  ;;  %621 = vmatpush3.msra.mxu0 %v107_v16 }
  0x5e   :  { %426 = vmatprep.mubr.f32.mxu0 %v212_v15  ;;  %656 = vmatpush3.msra.mxu1 %v139_v51 }
  0x5f   :  { %496 = vmatprep.mubr.f32.mxu1 %v213_v17  ;;  %427 = vmatmul.mubr.f32.vlgmr.msra.gmra.mxu0 %v204_v5 }
  0x60   :  { %497 = vmatmul.mubr.f32.vlgmr.msra.gmra.mxu1 %v211_v8 }
  0xfd   :  { %v552_v18 = vpop.f32.mrf.mxu0 }
  0xff   :  { %v587_v19 = vpop.f32.mrf.mxu1  ;;  %v553_v20 = vpop.f32.mrf.mxu0 }
 0x100   :  { %v554_v21 = vadd.f32 %v553_v20, %v552_v18 }
 0x101   :  { %v588_v23 = vpop.f32.mrf.mxu1 }
 0x102   :  { %v289_v24 = vadd.f32 %v554_v21, %v519_v22  ;;  %v589_v25 = vadd.f32 %v588_v23, %v587_v19 }
 0x104   :  { %v359_v30 = vadd.f32 %v589_v25, %v289_v24 }
 0x11f   :  { %v622_v26 = vpop.f32.mrf.mxu0 }
 0x120   :  { %v657_v27 = vpop.f32.mrf.mxu1 }
 0x121   :  { %v623_v28 = vpop.f32.mrf.mxu0 }
 0x122   :  { %v658_v29 = vpop.f32.mrf.mxu1  ;;  %v624_v31 = vadd.f32 %v623_v28, %v622_v26 }
 0x123   :  { %v659_v33 = vadd.f32 %v658_v29, %v657_v27 }
 0x124   :  { %v429_v32 = vadd.f32 %v624_v31, %v359_v30 }
 0x126   :  { %v499_v34 = vadd.f32 %v659_v33, %v429_v32 }
 0x128   :  { %502 = vst [vmem:[#allocation7] sm:$0x3] %v499_v34 }
 0x129   :  { %719 = shalt.err (!%p716_p0)
}
 0x12a   :  { %512 = dma.vmem_to_hbm [thread:$0]  %s510_s25, 32, %s781_s3, [#allocation4]  }
 0x12b   :  { %732 = dma.done.wait [#allocation4], 32  }
 0x12c   :  { %733 = vsyncadd [#allocation4], 4294967264 }
 0x12d   :  { %516 = vsyncpa [#allocation3], 1 }
 0x12e   :  { %517 = vsyncpa [#allocation6], 1 }
 0x12f   :  { %518 = vsyncpa [#allocation4], 1 }

</bundles_post_ra>
